<compile_context>
chip_gen: v5e
topology: v5e:2x2
jax: 0.10.0
libtpu: 0.0.40
codegen_flags: <defaults>
</compile_context>

<pallas_src>
import functools
import math

import jax
import jax.numpy as jnp
from jax.experimental import pallas as pl
from jax.experimental.pallas import tpu as pltpu


# TODO(synk): the wrapped `fn` in the PyTorch module is arbitrary; here it is
# instantiated as a deterministic Linear(D, D) and fused into the kernel.


def _preshift_matmul_kernel(x_ref, m_ref, w_ref, b_ref, o_ref, xs_ref, acc_ref, *,
                            shifts, feats, seq_len, tk, compute_dtype, stage_per_n):
    # x_ref:   (M, D)      batch-block of rows (M = bb*S), f32
    # m_ref:   (M, 1)      float mask for those rows
    # w_ref:   (tk, tn)    weight tile (already compute_dtype)
    # b_ref:   (1, tn)     bias tile (f32)
    # o_ref:   (M, tn)     output tile
    # xs_ref:  (nk, M, tk) staged token-shifted slab (compute_dtype), reused over (n, k)
    # acc_ref: (M, tn)     f32 accumulator, resident across K
    n = pl.program_id(1)
    k = pl.program_id(2)
    nk = xs_ref.shape[0]

    stage_cond = (k == 0) if stage_per_n else jnp.logical_and(n == 0, k == 0)

    @pl.when(stage_cond)
    def _stage():
        x = x_ref[...]                                   # (M, D) f32
        M, D = x.shape
        shifted = x                                      # shift==0 segments / "rest": unchanged
        if any(a != 0 for a in shifts):
            m = m_ref[...]                               # (M, 1) f32
            xm = x * m                                   # mask only affects shifted segments
            row = jax.lax.broadcasted_iota(jnp.int32, (M, 1), 0) % seq_len
            lane = jax.lax.broadcasted_iota(jnp.int32, (1, D), 1)
            for i, amt in enumerate(shifts):
                if amt == 0:
                    continue
                # out[s] = xm[s - amt] if 0 <= s - amt < seq_len else 0
                rolled = pltpu.roll(xm, amt % M, axis=0)          # XLU sublane rotation
                valid = (row >= amt) if amt > 0 else (row < seq_len + amt)
                seg_val = jnp.where(valid, rolled, 0.0)           # (M,1) bcast
                in_seg = (lane >= i * feats) & (lane < (i + 1) * feats)
                shifted = jnp.where(in_seg, seg_val, shifted)     # (1,D) bcast
        shifted = shifted.astype(compute_dtype)          # cast once, at the MXU boundary
        for ki in range(nk):                             # static, lane-aligned slices
            xs_ref[ki] = shifted[:, ki * tk:(ki + 1) * tk]

    @pl.when(k == 0)
    def _init():
        acc_ref[...] = jnp.zeros_like(acc_ref)

    acc_ref[...] += jnp.dot(xs_ref[k], w_ref[...],
                            preferred_element_type=jnp.float32)

    @pl.when(k == pl.num_programs(2) - 1)
    def _finalize():
        o_ref[...] = (acc_ref[...] + b_ref[...]).astype(o_ref.dtype)


def _pick_tile(d, candidates=(512, 256, 128)):
    for c in candidates:
        if d % c == 0:
            return c
    return d


def _pick_bb(batch, seq, m_target=512):
    """Largest batch fold with bb*S <= m_target; keep >=2 parallel grid steps."""
    divs = [d for d in range(1, batch + 1) if batch % d == 0]
    fit = [d for d in divs if d * seq <= m_target] or [1]
    bb = max(fit)
    if batch // bb == 1 and batch > 1:
        two = [d for d in fit if batch // d >= 2]       # v7x has 2 TensorCores
        if two:
            bb = max(two)
    return bb


def _vmem_limit_bytes(M, D, tk, tn, nk, compute_dtype, out_dtype):
    f32 = 4
    cd = jnp.dtype(compute_dtype).itemsize
    od = jnp.dtype(out_dtype).itemsize
    needed = (2 * M * D * f32        # x block (double-buffered)
              + 2 * M * f32          # mask block
              + 2 * tk * tn * cd     # weight tile
              + 2 * tn * f32         # bias tile
              + 2 * M * tn * od      # output tile
              + nk * M * tk * cd     # staged shifted slab
              + M * tn * f32)        # f32 accumulator
    # generous headroom, but never request v7x's full 64 MiB physical VMEM
    return int(min(max(2 * needed, 32 * 1024 * 1024), 48 * 1024 * 1024))


def pre_shift_tokens_linear(x, mask, weight, bias, shifts, *,
                            compute_dtype=jnp.bfloat16, bb=None, tn=None, tk=None):
    """x: (B,S,D) f32, mask: (B,S) bool or None, weight: (D,D), bias: (D,)."""
    B, S, D = x.shape
    shifts = tuple(int(a) for a in shifts)
    n_seg = len(shifts)
    feats = D // n_seg
    assert all(abs(a) < S for a in shifts), "|shift| must be < sequence length"

    if mask is None:
        mask = jnp.ones((B, S), dtype=jnp.bool_)

    if tn is None:
        tn = _pick_tile(D)
    if tk is None:
        tk = _pick_tile(D)
    nt, nk = D // tn, D // tk

    if bb is None:
        bb = _pick_bb(B, S)
    if (bb * S) % 8 != 0 and bb != B:
        bb = B                              # block 2nd-minor dim must be 8-aligned or full
    nb = B // bb
    M = bb * S

    x2 = x.reshape(B * S, D)
    m2 = mask.astype(jnp.float32).reshape(B * S, 1)
    w = weight.astype(compute_dtype)        # cast once in the wrapper (bf16 HBM traffic)
    b2 = bias.reshape(1, D).astype(jnp.float32)

    stage_per_n = (nb == 1 and nt > 1)      # give v7x's 2nd core the N axis if B collapses
    dims = ("parallel", "parallel" if stage_per_n else "arbitrary", "arbitrary")

    kernel = functools.partial(
        _preshift_matmul_kernel,
        shifts=shifts, feats=feats, seq_len=S, tk=tk,
        compute_dtype=compute_dtype, stage_per_n=stage_per_n,
    )

    out = pl.pallas_call(
        kernel,
        out_shape=jax.ShapeDtypeStruct((B * S, D), x.dtype),
        grid_spec=pltpu.PrefetchScalarGridSpec(
            num_scalar_prefetch=0,
            grid=(nb, nt, nk),
            in_specs=[
                pl.BlockSpec((M, D), lambda b, n, k: (b, 0)),   # x batch-block (const over n,k)
                pl.BlockSpec((M, 1), lambda b, n, k: (b, 0)),   # mask
                pl.BlockSpec((tk, tn), lambda b, n, k: (k, n)),  # weight tile
                pl.BlockSpec((1, tn), lambda b, n, k: (0, n)),   # bias tile
            ],
            out_specs=pl.BlockSpec((M, tn), lambda b, n, k: (b, n)),
            scratch_shapes=[
                pltpu.VMEM((nk, M, tk), compute_dtype),          # staged shifted slab
                pltpu.VMEM((M, tn), jnp.float32),                # f32 accumulator
            ],
        ),
        compiler_params=pltpu.CompilerParams(
            dimension_semantics=dims,
            vmem_limit_bytes=_vmem_limit_bytes(M, D, tk, tn, nk, compute_dtype, x.dtype),
        ),
    )(x2, m2, w, b2)
    return out.reshape(B, S, D)


def _reference(x, mask, weight, bias, shifts):
    """Pure-JAX transcription of the PyTorch forward for verification."""
    n_seg = len(shifts)
    D = x.shape[-1]
    feats = D // n_seg
    m = mask.astype(x.dtype)[..., None]
    outs = []
    for i, amt in enumerate(shifts):
        seg = x[..., i * feats:(i + 1) * feats]
        if amt == 0:
            outs.append(seg)
            continue
        seg = seg * m
        if amt > 0:
            seg = jnp.concatenate(
                [jnp.zeros_like(seg[:, :amt]), seg[:, : seg.shape[1] - amt]], axis=1)
        else:
            a = -amt
            seg = jnp.concatenate(
                [seg[:, a:], jnp.zeros_like(seg[:, :a])], axis=1)
        outs.append(seg)
    if n_seg * feats < D:
        outs.append(x[..., n_seg * feats:])
    xs = jnp.concatenate(outs, axis=-1)
    return xs @ weight + bias


def _make_inputs(key, B, S, D, lengths):
    kx, kw, kb = jax.random.split(key, 3)
    x = jax.random.normal(kx, (B, S, D), dtype=jnp.float32)
    seq_idx = jnp.arange(S)[None, :]
    mask = seq_idx < jnp.asarray(lengths, dtype=jnp.int32)[:, None]   # (B, S) bool
    bound = 1.0 / math.sqrt(D)
    weight = jax.random.uniform(kw, (D, D), jnp.float32, -bound, bound)
    bias = jax.random.uniform(kb, (D,), jnp.float32, -bound, bound)
    return x, mask, weight, bias


if __name__ == "__main__":
    key = jax.random.PRNGKey(0)
    k1, k2, k3 = jax.random.split(key, 3)

    # Case 1: tiny shape, non-128-aligned segments + "rest" features.
    B, S, D = 2, 8, 32
    shifts = (0, 1, -1)
    x, mask, weight, bias = _make_inputs(k1, B, S, D, lengths=[6, 8])
    ref = _reference(x, mask, weight, bias, shifts)

    out_f32 = jax.block_until_ready(
        pre_shift_tokens_linear(x, mask, weight, bias, shifts,
                                compute_dtype=jnp.float32))
    assert out_f32.shape == (B, S, D)
    assert jnp.allclose(out_f32, ref, atol=1e-5, rtol=1e-5), "f32 mismatch (case 1)"

    out_bf16 = jax.block_until_ready(
        pre_shift_tokens_linear(x, mask, weight, bias, shifts))      # default bf16 MXU
    assert jnp.allclose(out_bf16, ref, atol=1e-1, rtol=1e-1), "bf16 mismatch (case 1)"

    # Case 2: D=512 with forced 256 tiles -> grid (2, 2, 2): exercises K
    # accumulation, N tiling, and reuse of the staged shifted slab.
    B2, S2, D2 = 2, 16, 512
    shifts2 = (1, 0, -1, 2)
    x2, mask2, weight2, bias2 = _make_inputs(k2, B2, S2, D2, lengths=[11, 16])
    ref2 = _reference(x2, mask2, weight2, bias2, shifts2)

    out2 = jax.block_until_ready(
        pre_shift_tokens_linear(x2, mask2, weight2, bias2, shifts2,
                                compute_dtype=jnp.float32, tn=256, tk=256))
    assert out2.shape == (B2, S2, D2)
    assert jnp.allclose(out2, ref2, atol=1e-4, rtol=1e-4), "f32 mismatch (case 2)"

    out2_bf16 = jax.block_until_ready(
        pre_shift_tokens_linear(x2, mask2, weight2, bias2, shifts2, tn=256, tk=256))
    assert jnp.allclose(out2_bf16, ref2, atol=1e-1, rtol=1e-1), "bf16 mismatch (case 2)"

    # Case 3: batch folding (bb=2): two batch rows share one M block; rolls
    # cross the batch boundary but the row-validity mask zeroes the leakage.
    B3, S3, D3 = 4, 8, 256
    shifts3 = (1, -1)
    x3, mask3, weight3, bias3 = _make_inputs(k3, B3, S3, D3, lengths=[5, 8, 3, 7])
    ref3 = _reference(x3, mask3, weight3, bias3, shifts3)

    out3 = jax.block_until_ready(
        pre_shift_tokens_linear(x3, mask3, weight3, bias3, shifts3,
                                compute_dtype=jnp.float32, bb=2))
    assert jnp.allclose(out3, ref3, atol=1e-4, rtol=1e-4), "f32 mismatch (case 3, batch fold)"

    out3_bf16 = jax.block_until_ready(
        pre_shift_tokens_linear(x3, mask3, weight3, bias3, shifts3, bb=2))
    assert jnp.allclose(out3_bf16, ref3, atol=1e-1, rtol=1e-1), "bf16 mismatch (case 3)"

    print("KERNEL_OK")
</pallas_src>

<mosaic_0001>
module attributes {stable_mosaic.version = 11 : i64} {
  func.func @_preshift_matmul_kernel(%arg0: i32, %arg1: i32, %arg2: i32, %arg3: memref<8x32xf32, #tpu.memory_space<vmem>>, %arg4: memref<8x1xf32, #tpu.memory_space<vmem>>, %arg5: memref<32x32xf32, #tpu.memory_space<vmem>>, %arg6: memref<1x32xf32, #tpu.memory_space<vmem>>, %arg7: memref<8x32xf32, #tpu.memory_space<vmem>>, %arg8: memref<1x8x32xf32, #tpu.memory_space<vmem>>, %arg9: memref<8x32xf32, #tpu.memory_space<vmem>>) attributes {dimension_semantics = [#tpu.dimension_semantics<parallel>, #tpu.dimension_semantics<arbitrary>, #tpu.dimension_semantics<arbitrary>], iteration_bounds = array<i64: 2, 1, 1>, scalar_prefetch = 0 : i64, scratch_operands = 2 : i64, tpu.core_type = #tpu.core_type<tc>, window_params = [{transform_indices = @transform_0, window_bounds = array<i64: 8, 32>}, {transform_indices = @transform_1, window_bounds = array<i64: 8, 1>}, {transform_indices = @transform_2, window_bounds = array<i64: 32, 32>}, {transform_indices = @transform_3, window_bounds = array<i64: 1, 32>}, {transform_indices = @transform_4, window_bounds = array<i64: 8, 32>}]} {
    %c0_i32 = arith.constant 0 : i32
    %0 = arith.cmpi eq, %arg1, %c0_i32 : i32
    %c0_i32_0 = arith.constant 0 : i32
    %1 = arith.cmpi eq, %arg2, %c0_i32_0 : i32
    %2 = arith.andi %0, %1 : i1
    %3 = arith.extui %2 : i1 to i32
    %c0_i32_1 = arith.constant 0 : i32
    %4 = arith.cmpi ne, %3, %c0_i32_1 : i32
    scf.if %4 {
      %c0_13 = arith.constant 0 : index
      %c0_14 = arith.constant 0 : index
      %19 = vector.load %arg3[%c0_13, %c0_14] : memref<8x32xf32, #tpu.memory_space<vmem>>, vector<8x32xf32>
      %c0_15 = arith.constant 0 : index
      %c0_16 = arith.constant 0 : index
      %20 = vector.load %arg4[%c0_15, %c0_16] : memref<8x1xf32, #tpu.memory_space<vmem>>, vector<8x1xf32>
      %21 = vector.broadcast %20 : vector<8x1xf32> to vector<8x32xf32>
      %22 = arith.mulf %19, %21 : vector<8x32xf32>
      %23 = tpu.iota {dimensions = array<i32: 0>} : vector<8x1xi32>
      %c8_i32 = arith.constant 8 : i32
      %c0_i32_17 = arith.constant 0 : i32
      %24 = arith.cmpi eq, %c8_i32, %c0_i32_17 : i32
      %c1_i32 = arith.constant 1 : i32
      %25 = arith.select %24, %c1_i32, %c8_i32 : i32
      %26 = vector.broadcast %25 : i32 to vector<8x1xi32>
      %27 = arith.remsi %23, %26 : vector<8x1xi32>
      %c0_i32_18 = arith.constant 0 : i32
      %28 = vector.broadcast %c0_i32_18 : i32 to vector<8x1xi32>
      %29 = arith.cmpi ne, %27, %28 : vector<8x1xi32>
      %c0_i32_19 = arith.constant 0 : i32
      %30 = vector.broadcast %c0_i32_19 : i32 to vector<8x1xi32>
      %31 = arith.cmpi slt, %27, %30 : vector<8x1xi32>
      %c0_i32_20 = arith.constant 0 : i32
      %32 = arith.cmpi slt, %25, %c0_i32_20 : i32
      %33 = vector.broadcast %32 : i1 to vector<8x1xi1>
      %34 = vector.broadcast %33 : vector<8x1xi1> to vector<8x1xi1>
      %35 = arith.xori %31, %34 : vector<8x1xi1>
      %36 = arith.andi %35, %29 : vector<8x1xi1>
      %37 = vector.broadcast %25 : i32 to vector<8x1xi32>
      %38 = arith.addi %27, %37 : vector<8x1xi32>
      %39 = arith.select %36, %38, %27 : vector<8x1xi1>, vector<8x1xi32>
      %40 = tpu.iota {dimensions = array<i32: 1>} : vector<1x32xi32>
      %c1_i32_21 = arith.constant 1 : i32
      %41 = tpu.dynamic_rotate %22 by %c1_i32_21 dim 0 : vector<8x32xf32>, i32 -> vector<8x32xf32>
      %c1_i32_22 = arith.constant 1 : i32
      %42 = vector.broadcast %c1_i32_22 : i32 to vector<8x1xi32>
      %43 = arith.cmpi sge, %39, %42 : vector<8x1xi32>
      %cst_23 = arith.constant 0.000000e+00 : f32
      %44 = vector.shape_cast %43 : vector<8x1xi1> to vector<8x1xi1>
      %45 = vector.broadcast %44 : vector<8x1xi1> to vector<8x32xi1>
      %46 = vector.broadcast %cst_23 : f32 to vector<8x32xf32>
      %47 = arith.select %45, %41, %46 : vector<8x32xi1>, vector<8x32xf32>
      %c10_i32 = arith.constant 10 : i32
      %48 = vector.broadcast %c10_i32 : i32 to vector<1x32xi32>
      %49 = arith.cmpi sge, %40, %48 : vector<1x32xi32>
      %c20_i32 = arith.constant 20 : i32
      %50 = vector.broadcast %c20_i32 : i32 to vector<1x32xi32>
      %51 = arith.cmpi slt, %40, %50 : vector<1x32xi32>
      %52 = arith.andi %49, %51 : vector<1x32xi1>
      %53 = vector.shape_cast %52 : vector<1x32xi1> to vector<1x32xi1>
      %54 = vector.broadcast %53 : vector<1x32xi1> to vector<8x32xi1>
      %55 = arith.select %54, %47, %19 : vector<8x32xi1>, vector<8x32xf32>
      %c7_i32 = arith.constant 7 : i32
      %56 = tpu.dynamic_rotate %22 by %c7_i32 dim 0 : vector<8x32xf32>, i32 -> vector<8x32xf32>
      %c7_i32_24 = arith.constant 7 : i32
      %57 = vector.broadcast %c7_i32_24 : i32 to vector<8x1xi32>
      %58 = arith.cmpi slt, %39, %57 : vector<8x1xi32>
      %cst_25 = arith.constant 0.000000e+00 : f32
      %59 = vector.shape_cast %58 : vector<8x1xi1> to vector<8x1xi1>
      %60 = vector.broadcast %59 : vector<8x1xi1> to vector<8x32xi1>
      %61 = vector.broadcast %cst_25 : f32 to vector<8x32xf32>
      %62 = arith.select %60, %56, %61 : vector<8x32xi1>, vector<8x32xf32>
      %c20_i32_26 = arith.constant 20 : i32
      %63 = vector.broadcast %c20_i32_26 : i32 to vector<1x32xi32>
      %64 = arith.cmpi sge, %40, %63 : vector<1x32xi32>
      %c30_i32 = arith.constant 30 : i32
      %65 = vector.broadcast %c30_i32 : i32 to vector<1x32xi32>
      %66 = arith.cmpi slt, %40, %65 : vector<1x32xi32>
      %67 = arith.andi %64, %66 : vector<1x32xi1>
      %68 = vector.shape_cast %67 : vector<1x32xi1> to vector<1x32xi1>
      %69 = vector.broadcast %68 : vector<1x32xi1> to vector<8x32xi1>
      %70 = arith.select %69, %62, %55 : vector<8x32xi1>, vector<8x32xf32>
      %c0_27 = arith.constant 0 : index
      %c0_28 = arith.constant 0 : index
      %c0_29 = arith.constant 0 : index
      %71 = vector.load %arg8[%c0_27, %c0_28, %c0_29] : memref<1x8x32xf32, #tpu.memory_space<vmem>>, vector<1x8x32xf32>
      %72 = vector.shape_cast %71 : vector<1x8x32xf32> to vector<8x32xf32>
      %73 = vector.shape_cast %70 : vector<8x32xf32> to vector<1x8x32xf32>
      tpu.vector_store %arg8[%c0_27, %c0_28, %c0_29], %73 {strides = array<i32>} : memref<1x8x32xf32, #tpu.memory_space<vmem>>, vector<1x8x32xf32>,
    } else {
    }
    %c0_i32_2 = arith.constant 0 : i32
    %5 = arith.cmpi eq, %arg2, %c0_i32_2 : i32
    %6 = arith.extui %5 : i1 to i32
    %c0_i32_3 = arith.constant 0 : i32
    %7 = arith.cmpi ne, %6, %c0_i32_3 : i32
    scf.if %7 {
      %cst_13 = arith.constant 0.000000e+00 : f32
      %19 = vector.broadcast %cst_13 : f32 to vector<8x32xf32>
      %c0_14 = arith.constant 0 : index
      %c0_15 = arith.constant 0 : index
      %20 = vector.load %arg9[%c0_14, %c0_15] : memref<8x32xf32, #tpu.memory_space<vmem>>, vector<8x32xf32>
      tpu.vector_store %arg9[%c0_14, %c0_15], %19 {strides = array<i32>} : memref<8x32xf32, #tpu.memory_space<vmem>>, vector<8x32xf32>,
    } else {
    }
    %c0 = arith.constant 0 : index
    %c0_4 = arith.constant 0 : index
    %8 = vector.load %arg9[%c0, %c0_4] : memref<8x32xf32, #tpu.memory_space<vmem>>, vector<8x32xf32>
    %9 = arith.index_cast %arg2 : i32 to index
    %c0_5 = arith.constant 0 : index
    %c0_6 = arith.constant 0 : index
    %10 = vector.load %arg8[%9, %c0_5, %c0_6] : memref<1x8x32xf32, #tpu.memory_space<vmem>>, vector<1x8x32xf32>
    %11 = vector.shape_cast %10 : vector<1x8x32xf32> to vector<8x32xf32>
    %c0_7 = arith.constant 0 : index
    %c0_8 = arith.constant 0 : index
    %12 = vector.load %arg5[%c0_7, %c0_8] : memref<32x32xf32, #tpu.memory_space<vmem>>, vector<32x32xf32>
    %cst = arith.constant dense<0.000000e+00> : vector<8x32xf32>
    %13 = tpu.matmul %11, %12, %cst {dimension_numbers = #tpu.dot_dimension_numbers<[1], [0], [0], [1], [0, 0, 1, 1], [], []>} : vector<8x32xf32>, vector<32x32xf32>, vector<8x32xf32> -> vector<8x32xf32>
    %14 = arith.addf %8, %13 : vector<8x32xf32>
    %c0_9 = arith.constant 0 : index
    %c0_10 = arith.constant 0 : index
    %15 = vector.load %arg9[%c0_9, %c0_10] : memref<8x32xf32, #tpu.memory_space<vmem>>, vector<8x32xf32>
    tpu.vector_store %arg9[%c0_9, %c0_10], %14 {strides = array<i32>} : memref<8x32xf32, #tpu.memory_space<vmem>>, vector<8x32xf32>,
    %c0_i32_11 = arith.constant 0 : i32
    %16 = arith.cmpi eq, %arg2, %c0_i32_11 : i32
    %17 = arith.extui %16 : i1 to i32
    %c0_i32_12 = arith.constant 0 : i32
    %18 = arith.cmpi ne, %17, %c0_i32_12 : i32
    scf.if %18 {
      %c0_13 = arith.constant 0 : index
      %c0_14 = arith.constant 0 : index
      %19 = vector.load %arg9[%c0_13, %c0_14] : memref<8x32xf32, #tpu.memory_space<vmem>>, vector<8x32xf32>
      %c0_15 = arith.constant 0 : index
      %c0_16 = arith.constant 0 : index
      %20 = vector.load %arg6[%c0_15, %c0_16] : memref<1x32xf32, #tpu.memory_space<vmem>>, vector<1x32xf32>
      %21 = vector.broadcast %20 : vector<1x32xf32> to vector<8x32xf32>
      %22 = arith.addf %19, %21 : vector<8x32xf32>
      %c0_17 = arith.constant 0 : index
      %c0_18 = arith.constant 0 : index
      %23 = vector.load %arg7[%c0_17, %c0_18] : memref<8x32xf32, #tpu.memory_space<vmem>>, vector<8x32xf32>
      tpu.vector_store %arg7[%c0_17, %c0_18], %22 {strides = array<i32>} : memref<8x32xf32, #tpu.memory_space<vmem>>, vector<8x32xf32>,
    } else {
    }
    return
  }
  func.func @transform_0(%arg0: i32, %arg1: i32, %arg2: i32) -> (i32, i32) {
    %c0_i32 = arith.constant 0 : i32
    %c0_i32_0 = arith.constant 0 : i32
    return %arg0, %c0_i32 : i32, i32
  }
  func.func @transform_1(%arg0: i32, %arg1: i32, %arg2: i32) -> (i32, i32) {
    %c0_i32 = arith.constant 0 : i32
    %c0_i32_0 = arith.constant 0 : i32
    return %arg0, %c0_i32 : i32, i32
  }
  func.func @transform_2(%arg0: i32, %arg1: i32, %arg2: i32) -> (i32, i32) {
    %c0_i32 = arith.constant 0 : i32
    return %arg2, %arg1 : i32, i32
  }
  func.func @transform_3(%arg0: i32, %arg1: i32, %arg2: i32) -> (i32, i32) {
    %c0_i32 = arith.constant 0 : i32
    %c0_i32_0 = arith.constant 0 : i32
    return %c0_i32, %arg1 : i32, i32
  }
  func.func @transform_4(%arg0: i32, %arg1: i32, %arg2: i32) -> (i32, i32) {
    %c0_i32 = arith.constant 0 : i32
    return %arg0, %arg1 : i32, i32
  }
}

</mosaic_0001>

<bundles_post_ra>
// kernel: tpu_custom_call.1
= control target key start
LH: loop header
LB: loop body
LE: loop exit
PB: predicated region body
PF: predicated region fallthrough
CT: control target
= control target key end

     0   :  { %9 = vsyncpa [#allocation5], 0  ;;  %s850_s0 = inlined_call_operand.vmem [shape: f32[16,32], index: 0, kind: input, shape index: {}]   ;;  %s851_s1 = inlined_call_operand.vmem [shape: f32[16,1], index: 1, kind: input, shape index: {}]   ;;  %s852_s2 = inlined_call_operand.hbm [shape: f32[32,32], index: 2, kind: input, shape index: {}]   ;;  %s853_s3 = inlined_call_operand.vmem [shape: f32[1,32], index: 3, kind: input, shape index: {}]   ;;  %s854_s4 = inlined_call_operand.hbm [shape: f32[16,32], index: 4, kind: output, shape index: {}]  }
   0x1   :  { %10 = vsyncpa [#allocation6], 0 }
   0x2   :  { %12 = vsyncpa [#allocation6 + $0x1], 0  ;;  %s739_s15 = smov 0   ;;  %s741_s16 = smov 0  }
   0x3   :  { %s743_s17 = smov 0   ;;  %s745_s18 = smov 0  }
   0x4   :  { %s747_s19 = smov 0   ;;  %s749_s20 = smov 0  }
   0x5 LB: > { %s507_s21 = sadd.s32 4294967295, %s707_s20   ;;  %s508_s22 = sadd.s32 4294967294, %s707_s20   ;;  %s707_s20 = sphi %s749_s20, %s18_s20   ;;  %s703_s19 = sphi %s747_s19, %s861_s19   ;;  %s699_s18 = sphi %s745_s18, %s860_s18   ;;  %s695_s17 = sphi %s743_s17, %s859_s17   ;;  %s691_s16 = sphi %s741_s16, %s858_s16   ;;  %s687_s15 = sphi %s739_s15, %s857_s15  }
   0x6   : > { %s37_s23 = sadd.s32 1, %s703_s19  ;;  %s152_s24 = sadd.s32 1, %s695_s17 }
   0x7   : > { %p39_p0 = scmp.ge.s32.totalorder %s37_s23, 2  ;;  %p162_p1 = scmp.ne.s32.totalorder %s695_s17, %s691_s16 }
   0x8   : > { %p163_p2 = scmp.eq.s32.totalorder %s507_s21, 1  ;;  %p168_p3 = scmp.ne.s32.totalorder %s691_s16, %s687_s15 }
   0x9   : > { %s863_s23 = smov (%p39_p0, %s37_s23), 0  ;;  %p169_p5 = scmp.eq.s32.totalorder %s508_s22, 1 }
   0xa   : > { %p779_p4 = por %p163_p2, %p162_p1  ;;  %s147_s26 = ssub.s32 %s703_s19, %s863_s23 }
   0xb   : > { %p509_p6 = scmp.ge.s32.totalorder %s707_s20, 1  ;;  %p150_p7 = scmp.eq.s32.totalorder %s147_s26, 0 }
   0xc   : > { %p786_p8 = por %p169_p5, %p168_p3  ;;  %p176_p9 = scmp.lt.s32.totalorder %s707_s20, 3 }
   0xd   : > { %s792_s28 = scalar_select %p150_p7, %s695_s17, %s152_s24  }
   0xe   : > { %p177_p10 = pnand %p509_p6, %p176_p9  ;;  %p537_p11 = scmp.eq.s32.totalorder %s507_s21, 0 }
   0xf   : > { %s191_s5 = sshll.u32 %s852_s2, 4  ;;  %s709_s6 = smov [#allocation4]   ;;  %s192_s5 = int_to_ptr.hbm [resolvable:$true] %s191_s5 }
  0x10   : > { %p529_p12 = pneg %p177_p10  ;;  %s193_s7 = sshll.u32 %s709_s6, 4  ;;  %s194_s7 = int_to_ptr.vmem [resolvable:$true] %s193_s7 }
  0x11   : > { %s710_s8 = smov 128   ;;  %s711_s9 = smov 8  }
  0x12   : > { %p530_p13 = pnand %p537_p11, %p529_p12  ;;  %229 = sbr.rel (%p177_p10) target bundleno = 302 (0x12e), region = 36 }
  0x14   : > { %532 = dma.hbm_to_vmem [thread:$0]  (!%p530_p13), %s192_s5, 512, %s194_s7, [#allocation5], %s710_s8, %s710_s8, %s711_s9  }
  0x17   : > { %678 = dma.done.wait (%p537_p11), [#allocation5], 512  }
  0x18   : > { %680 = vsyncadd (%p537_p11), [#allocation5], 4294966784  ;;  %p262_p0 = scmp.lt.s32.totalorder %s699_s18, 1  ;;  %v712_v0 = vmov 0   ;;  %v340_v2 = vld [vmem:[#allocation4 + $0x18] sm:$0xff]  ;;  %v339_v3 = vld [vmem:[#allocation4 + $0x10] sm:$0xff]  ;;  %v288_v7 = vlaneseq }
  0x19   : > { %593 = vset.pattern.permute.xlu0 %v712_v0  ;;  %357 = vmatpush.msra.mxu0 %v340_v2  ;;  %vm326_vm0 = vcmask 261120   ;;  %v338_v4 = vld [vmem:[#allocation4 + $0x8] sm:$0xff]  ;;  %v713_v5 = vmov 0.0   ;;  %v337_v6 = vld [vmem:[#allocation4] sm:$0xff]  ;;  %s259_s26 = sand.u32 1, %s691_s16   ;;  %s520_s30 = sshll.u32 %s699_s18, 3 }
  0x1a   : > { %s263_s10 = scalar_select %p262_p0, %s699_s18, 1  ;;  %332 = vst.msk [vmem:[#allocation3] sm:$0xff] %vm326_vm0, %v713_v5  ;;  %v289_v8 = vshrl.u32 %v288_v7, 7  ;;  %v303_v9 = vand.u32 127, %v288_v7  ;;  %v594_v24 = vld [vmem:[%s853_s3] ss:$0 sm:$0xff] }
  0x1b   : > { %358 = vmatpush.msra.mxu0 %v339_v3  ;;  %s515_s29 = sshll.u32 %s259_s26, 3  ;;  %s389_s7 = scalar_lea.hbm %s854_s4, %s520_s30 }
  0x1c   : > { %s516_s11 = sshll.u32 %s263_s10, 3  ;;  %v294_v10 = vand.u32 7, %v289_v8  ;;  %vm309_vm1 = vcmp.ge.s32.totalorder %v303_v9, 10  ;;  %vm310_vm2 = vcmp.lt.s32.totalorder %v303_v9, 20  ;;  %vm320_vm3 = vcmp.ge.s32.totalorder %v303_v9, 20  ;;  %s261_s10 = scalar_lea.vmem [#allocation7], %s515_s29 }
  0x1d   : > { %s269_s14 = scalar_lea.vmem %s851_s1, %s516_s11  ;;  %359 = vmatpush.msra.mxu0 %v338_v4  ;;  %s265_s24 = scalar_lea.vmem %s850_s0, %s516_s11  ;;  %vm321_vm4 = vcmp.lt.s32.totalorder %v303_v9, 30  ;;  %vm311_vm7 = vmand %vm309_vm1, %vm310_vm2 }
  0x1e   : > { %v281_v1 = vld [vmem:[%s269_s14] sm:$0xff]  ;;  %vm305_vm5 = vcmp.ge.s32.totalorder %v294_v10, 1  ;;  %vm316_vm6 = vcmp.lt.s32.totalorder %v294_v10, 7  ;;  %vm322_vm8 = vmand %vm320_vm3, %vm321_vm4  ;;  %s391_s11 = sshll.u32 %s261_s10, 4  ;;  %s393_s12 = sshll.u32 %s389_s7, 4  ;;  %s392_s11 = int_to_ptr.vmem [resolvable:$true] %s391_s11  ;;  %s394_s12 = int_to_ptr.hbm [resolvable:$true] %s393_s12 }
  0x1f   : > { %284 = vperm.xlu0 %593, %v281_v1   ;;  %360 = vmatpush.msra.mxu0 %v337_v6  ;;  %v280_v11 = vld [vmem:[%s265_s24] sm:$0xff]  ;;  %s378_s18 = scalar_lea.sflag [#allocation6], %s259_s26  ;;  %s639_s13 = sshra.s32 %s394_s12, 4  ;;  %s640_s13 = int_to_ptr.hbm [resolvable:$true] %s639_s13 }
  0x20   : > { %s641_s14 = scalar_lea.hbm %s640_s13, 8  ;;  %s645_s24 = scalar_lea.hbm %s854_s4, 16 }
  0x21   : > { %v333_v21 = vld [vmem:[#allocation3] sm:$0xff]  ;;  %p642_p1 = scmp.ne.s32.totalorder %s640_s13, %s641_s14  ;;  %p646_p5 = scmp.lt.s32.totalorder %s640_s13, %s854_s4 }
  0x22   : > { %p647_p6 = scmp.lt.s32.totalorder %s645_s24, %s641_s14 }
  0x23   : > { %p643_p2 = pnand %p642_p1, %p779_p4 }
  0x24   : > { %p648_p7 = por %p647_p6, %p646_p5 }
  0x25   : > { %p644_p3 = pneg %p643_p2 }
  0x27   : > { %p649_p9 = pnand %p648_p7, %p644_p3 }
  0x91   : > { %v285_v12 = vpop.permute.xlu0 %284 }
  0x92   : > { %v287_v13 = vmul.f32 %v285_v12, %v280_v11 }
  0x94   : > { %v304_v14 = vrot.slane %v287_v13, 7  ;;  %v315_v15 = vrot.slane %v287_v13, 1 }
  0x96   : > { %v308_v16 = vsel %vm305_vm5, %v304_v14, 0.0  ;;  %v319_v17 = vsel %vm316_vm6, %v315_v15, 0.0 }
  0x97   : > { %v314_v18 = vsel %vm311_vm7, %v308_v16, %v280_v11 }
  0x98   : > { %v325_v19 = vsel %vm322_vm8, %v319_v17, %v314_v18 }
  0x99   : > { %327 = vst.msk [vmem:[#allocation2] sm:$0xff] %vm326_vm0, %v325_v19 }
  0xa0   : > { %v336_v20 = vld [vmem:[#allocation2] sm:$0xff] }
  0xa1   : > { %518 = vmatmul.msk.f32.vlgmr.msra.gmra.mxu0 %vm326_vm0, %v336_v20 }
 0x11e   : > { %v362_v22 = vpop.f32.mrf.mxu0 }
 0x11f   : > { %v365_v23 = vadd.f32 %v362_v22, %v333_v21 }
 0x121   : > { %366 = vst.msk [vmem:[#allocation3] sm:$0xff] %vm326_vm0, %v365_v23 }
 0x128   : > { %v370_v25 = vld [vmem:[#allocation3] sm:$0xff] }
 0x129   : > { %v375_v26 = vadd.f32 %v594_v24, %v370_v25 }
 0x12b   : > { %376 = vst.msk [vmem:[%s261_s10] sm:$0xff] %vm326_vm0, %v375_v26 }
 0x12c   : > { %652 = shalt.err (!%p649_p9)
}
 0x12d   : > { %527 = dma.vmem_to_hbm [thread:$0]  (%p779_p4), %s392_s11, 128, %s394_s12, %s378_s18  }
 0x12e PF: > { %p539_p10 = scmp.ge.s32.totalorder %s707_s20, 2  ;;  %s405_s26 = sand.u32 1, %s687_s15  }
 0x12f   : > { %s406_s5 = scalar_lea.sflag [#allocation6], %s405_s26 }
 0x130   : > { %p534_p11 = pnand %p539_p10, %p786_p8 }
 0x132   : > { %p535_p12 = pneg %p534_p11 }
 0x134   : > { %682 = dma.done.wait (%p535_p12), %s406_s5, 128  }
 0x135   : > { %684 = vsyncadd (%p535_p12), %s406_s5, 4294967168  ;;  %s18_s20 = sadd.s32 1, %s707_s20   ;;  %s857_s15 = smov %s691_s16 }
 0x136   : > { %p15_p13 = scmp.ge.s32.totalorder %s18_s20, 4   ;;  %s858_s16 = smov %s695_s17 }
 0x137   : > { %s859_s17 = smov %s792_s28  ;;  %s860_s18 = smov %s703_s19 }
 0x138   : > { %s861_s19 = smov %s863_s23  ;;  %17 = sbr.rel (!%p15_p13) target bundleno = 5 (0x5), region = 96 }
 0x13d   :  { %412 = vsyncpa [#allocation5], 1 }
 0x13e   :  { %414 = vsyncpa [#allocation5 + $0x1], 1 }
 0x13f   :  { %415 = vsyncpa [#allocation6], 1 }
 0x140   :  { %417 = vsyncpa [#allocation6 + $0x1], 1 }

</bundles_post_ra>
